<compile_context>
chip_gen: v7x
topology: tpu7x:2x2x1
jax: 0.10.0
libtpu: 0.0.40
codegen_flags: <defaults>
</compile_context>

<pallas_src>
from functools import partial

import jax
import jax.numpy as jnp
from jax.experimental import pallas as pl
from jax.experimental.pallas import tpu as pltpu


def conv_v_kernel(col_ref, x_ref, w_ref, bias_ref, o_ref, *,
                  fh, fw, W, compute_dtype):
    # col_ref : (1, H*W) int32   time (width) index of every flattened position
    # x_ref   : (Cin, H*W)       raw activations, freq*time flattened onto lanes
    # w_ref   : (Cout, K)        K = fh*fw*Cin, BN scale folded in, compute dtype
    # bias_ref: (Cout, 1)        f32 folded conv-bias + BN shift
    # o_ref   : (Cout, WO_PAD)   f32, freq max-pool + bias + ReLU applied, lane-padded
    Cin, HW = x_ref.shape
    Cout, _ = w_ref.shape
    H = HW // W
    Ho = H - fh + 1
    HoW = Ho * W
    pad = fw // 2
    WO_PAD = o_ref.shape[-1]

    x = x_ref[...].astype(compute_dtype)                    # (Cin, HW), one VPU cast
    col = jnp.broadcast_to(col_ref[...], (Cin, HW))          # hoisted sublane broadcast

    # Width-halo handling without a wrapper-side pad: for tap dw the only source
    # columns ever read by *valid* output positions are [max(0,dw-pad), W-max(0,pad-dw));
    # zeroing the rest once per dw makes every rolled / row-wrapped lane contribute
    # exactly the Conv2d zero padding.
    x_dw = []
    for dw in range(fw):
        lo = dw - pad
        hi = W - (pad - dw)
        if lo <= 0 and hi >= W:
            x_dw.append(x)                                   # center tap: no mask
        else:
            keep = (col >= max(lo, 0)) & (col < min(hi, W))
            x_dw.append(jnp.where(keep, x, 0))

    # im2col: every (dh, dw) tap is a lane roll of the (masked) flattened tile (XLU
    # slot, overlaps VPU/MXU).  Row order (dh, dw, c) matches the (Cout, fh, fw, Cin)
    # weight reshape in the wrapper.
    rows = []
    for dh in range(fh):
        for dw in range(fw):
            s = dh * W + dw - pad                            # source offset of this tap
            t = x_dw[dw] if s == 0 else pltpu.roll(x_dw[dw], (-s) % HW, 1)
            rows.append(t[:, :HoW])
    xs = jnp.concatenate(rows, axis=0)                       # (K, Ho*W)

    # ONE lane-dense (Cout, K) @ (K, Ho*W) MXU contraction, f32 accumulation.
    res = jnp.dot(w_ref[...], xs, preferred_element_type=jnp.float32)   # (Cout, Ho*W)

    # Fused MaxPool over the whole freq axis: fold the Ho groups of W lanes.
    m = res[:, :W]
    for oh in range(1, Ho):
        m = jnp.maximum(m, res[:, oh * W:(oh + 1) * W])

    # Bias + ReLU hoisted after the max (max commutes with a uniform add; ReLU is
    # monotone) -> done once, not per freq row.
    out = jnp.maximum(m + bias_ref[...], 0.0)                # (Cout, W) f32

    if WO_PAD > W:   # lane-dense (unmasked) store; the wrapper slices the pad back off
        out = jnp.concatenate(
            [out, jnp.zeros((Cout, WO_PAD - W), jnp.float32)], axis=1)
    o_ref[...] = out.astype(o_ref.dtype)


def conv_v_forward(x_nchw, w_oihw, conv_bias, gamma, beta, run_mean, run_var,
                   eps=1e-5, compute_dtype=jnp.bfloat16):
    N, Cin, H, W = x_nchw.shape
    Cout, Cin_w, fh, fw = w_oihw.shape
    assert Cin_w == Cin
    if fw % 2 != 1:
        # TODO(synk): even filter widths (W_out = W + 1) need a different flattened
        #             layout; musicnn's vertical filters use odd widths.
        raise NotImplementedError("conv_v_forward assumes an odd filter width")
    assert fh <= H
    Wo = W                                   # stride 1, padding (0, fw//2), odd fw
    HW = H * W
    K = fh * fw * Cin
    WO_PAD = ((Wo + 127) // 128) * 128       # lane-dense output stores

    # Fold eval-mode BatchNorm into the conv weights and one per-channel bias.
    inv_std = 1.0 / jnp.sqrt(run_var.astype(jnp.float32) + eps)
    scale = gamma.astype(jnp.float32) * inv_std                          # (Cout,)
    w_fold = w_oihw.astype(jnp.float32) * scale[:, None, None, None]     # (Cout,Cin,fh,fw)
    # (Cout, fh, fw, Cin) -> (Cout, K); row index (dh*fw + dw)*Cin + c matches kernel.
    w2 = jnp.transpose(w_fold, (0, 2, 3, 1)).reshape(Cout, K).astype(compute_dtype)
    bias = (beta.astype(jnp.float32)
            + scale * (conv_bias.astype(jnp.float32) - run_mean.astype(jnp.float32)))
    bias2 = bias.reshape(Cout, 1)

    # Free (metadata-only) flatten of freq*time onto the lane axis; the activations are
    # read by the kernel exactly once, in their original dtype (no pad / cast HBM pass).
    x_flat = x_nchw.reshape(N, Cin, HW)
    col_idx = jnp.tile(jnp.arange(W, dtype=jnp.int32), H).reshape(1, HW)

    # NOTE: col_idx / w2 / bias2 have grid-invariant index maps, so Pallas keeps them
    #       resident across the batch loop (pipeline_mode=pl.Buffered(1) would also drop
    #       their second buffer; skipped since they are only a few KiB here).
    out = pl.pallas_call(
        partial(conv_v_kernel, fh=fh, fw=fw, W=W, compute_dtype=compute_dtype),
        out_shape=jax.ShapeDtypeStruct((N, Cout, WO_PAD), jnp.float32),
        grid=(N,),
        in_specs=[
            pl.BlockSpec((1, HW), lambda n: (0, 0)),
            pl.BlockSpec((None, Cin, HW), lambda n: (n, 0, 0)),
            pl.BlockSpec((Cout, K), lambda n: (0, 0)),
            pl.BlockSpec((Cout, 1), lambda n: (0, 0)),
        ],
        out_specs=pl.BlockSpec((None, Cout, WO_PAD), lambda n: (n, 0, 0)),
        compiler_params=pltpu.CompilerParams(
            dimension_semantics=("parallel",)),
    )(col_idx, x_flat, w2, bias2)

    return out[:, :, :Wo]                    # drop the lane padding -> (N, Cout, Wo)


def conv_v_reference(x_nchw, w_oihw, conv_bias, gamma, beta, run_mean, run_var,
                     eps=1e-5):
    pad = w_oihw.shape[3] // 2
    z = jax.lax.conv_general_dilated(
        x_nchw, w_oihw, window_strides=(1, 1),
        padding=((0, 0), (pad, pad)),
        dimension_numbers=("NCHW", "OIHW", "NCHW"),
        precision=jax.lax.Precision.HIGHEST)
    z = z + conv_bias[None, :, None, None]
    z = (z - run_mean[None, :, None, None]) / jnp.sqrt(
        run_var[None, :, None, None] + eps)
    z = z * gamma[None, :, None, None] + beta[None, :, None, None]
    z = jnp.maximum(z, 0.0)
    return jnp.max(z, axis=2)   # max over freq, squeezed -> (N, C_out, W_out)


if __name__ == "__main__":
    key = jax.random.PRNGKey(0)
    ks = jax.random.split(key, 7)

    N, Cin, H, W = 2, 4, 16, 16
    Cout, fh, fw = 8, 3, 3          # filter_shape = (3, 3)

    x = jax.random.normal(ks[0], (N, Cin, H, W), dtype=jnp.float32)
    w = jax.random.normal(ks[1], (Cout, Cin, fh, fw), dtype=jnp.float32) * 0.1
    b = jax.random.normal(ks[2], (Cout,), dtype=jnp.float32) * 0.1
    gamma = 1.0 + 0.1 * jax.random.normal(ks[3], (Cout,), dtype=jnp.float32)
    beta = 0.1 * jax.random.normal(ks[4], (Cout,), dtype=jnp.float32)
    run_mean = 0.1 * jax.random.normal(ks[5], (Cout,), dtype=jnp.float32)
    run_var = jax.random.uniform(ks[6], (Cout,), minval=0.5, maxval=1.5,
                                 dtype=jnp.float32)

    ref = conv_v_reference(x, w, b, gamma, beta, run_mean, run_var)

    # Tight check: f32 compute path must match the faithful reference closely.
    out_f32 = conv_v_forward(x, w, b, gamma, beta, run_mean, run_var,
                             compute_dtype=jnp.float32)
    out_f32 = jax.block_until_ready(out_f32)
    assert out_f32.shape == (N, Cout, W), out_f32.shape
    err_f32 = float(jnp.max(jnp.abs(out_f32 - ref)))
    assert err_f32 < 2e-3, err_f32

    # Default (perf) path: bf16 MXU operands, f32 accumulation / epilogue.
    out_bf16 = conv_v_forward(x, w, b, gamma, beta, run_mean, run_var)
    out_bf16 = jax.block_until_ready(out_bf16)
    assert out_bf16.shape == (N, Cout, W), out_bf16.shape
    err_bf16 = float(jnp.max(jnp.abs(out_bf16 - ref)))
    assert err_bf16 < 5e-2, err_bf16

    print("KERNEL_OK")
</pallas_src>

<mosaic_0001>
module attributes {stable_mosaic.version = 11 : i64} {
  func.func @conv_v_kernel(%arg0: i32, %arg1: memref<1x256xi32, #tpu.memory_space<vmem>>, %arg2: memref<1x4x256xf32, #tpu.memory_space<vmem>>, %arg3: memref<8x36xf32, #tpu.memory_space<vmem>>, %arg4: memref<8x1xf32, #tpu.memory_space<vmem>>, %arg5: memref<1x8x128xf32, #tpu.memory_space<vmem>>) attributes {dimension_semantics = [#tpu.dimension_semantics<parallel>], iteration_bounds = array<i64: 2>, scalar_prefetch = 0 : i64, scratch_operands = 0 : i64, tpu.core_type = #tpu.core_type<tc>, window_params = [{pipeline_mode = #tpu.pipeline_mode<synchronous>, transform_indices = @transform_0, window_bounds = array<i64: 1, 256>}, {transform_indices = @transform_1, window_bounds = array<i64: 1, 4, 256>}, {pipeline_mode = #tpu.pipeline_mode<synchronous>, transform_indices = @transform_2, window_bounds = array<i64: 8, 36>}, {pipeline_mode = #tpu.pipeline_mode<synchronous>, transform_indices = @transform_3, window_bounds = array<i64: 8, 1>}, {transform_indices = @transform_4, window_bounds = array<i64: 1, 8, 128>}]} {
    %c0 = arith.constant 0 : index
    %c0_0 = arith.constant 0 : index
    %c0_1 = arith.constant 0 : index
    %0 = vector.load %arg2[%c0, %c0_0, %c0_1] : memref<1x4x256xf32, #tpu.memory_space<vmem>>, vector<1x4x256xf32>
    %1 = vector.shape_cast %0 : vector<1x4x256xf32> to vector<4x256xf32>
    %c0_2 = arith.constant 0 : index
    %c0_3 = arith.constant 0 : index
    %2 = vector.load %arg1[%c0_2, %c0_3] : memref<1x256xi32, #tpu.memory_space<vmem>>, vector<1x256xi32>
    %3 = vector.shape_cast %2 : vector<1x256xi32> to vector<1x256xi32>
    %4 = vector.broadcast %3 : vector<1x256xi32> to vector<4x256xi32>
    %c0_i32 = arith.constant 0 : i32
    %5 = vector.broadcast %c0_i32 : i32 to vector<4x256xi32>
    %6 = arith.cmpi sge, %4, %5 : vector<4x256xi32>
    %c15_i32 = arith.constant 15 : i32
    %7 = vector.broadcast %c15_i32 : i32 to vector<4x256xi32>
    %8 = arith.cmpi slt, %4, %7 : vector<4x256xi32>
    %9 = arith.andi %6, %8 : vector<4x256xi1>
    %c0_i32_4 = arith.constant 0 : i32
    %10 = arith.sitofp %c0_i32_4 : i32 to f32
    %11 = vector.broadcast %10 : f32 to vector<4x256xf32>
    %12 = arith.select %9, %1, %11 : vector<4x256xi1>, vector<4x256xf32>
    %c1_i32 = arith.constant 1 : i32
    %13 = vector.broadcast %c1_i32 : i32 to vector<4x256xi32>
    %14 = arith.cmpi sge, %4, %13 : vector<4x256xi32>
    %c16_i32 = arith.constant 16 : i32
    %15 = vector.broadcast %c16_i32 : i32 to vector<4x256xi32>
    %16 = arith.cmpi slt, %4, %15 : vector<4x256xi32>
    %17 = arith.andi %14, %16 : vector<4x256xi1>
    %c0_i32_5 = arith.constant 0 : i32
    %18 = arith.sitofp %c0_i32_5 : i32 to f32
    %19 = vector.broadcast %18 : f32 to vector<4x256xf32>
    %20 = arith.select %17, %1, %19 : vector<4x256xi1>, vector<4x256xf32>
    %c1_i32_6 = arith.constant 1 : i32
    %21 = tpu.dynamic_rotate %12 by %c1_i32_6 dim 1 : vector<4x256xf32>, i32 -> vector<4x256xf32>
    %22 = vector.extract_strided_slice %21 {offsets = [0, 0], sizes = [4, 224], strides = [1, 1]} : vector<4x256xf32> to vector<4x224xf32>
    %23 = vector.extract_strided_slice %1 {offsets = [0, 0], sizes = [4, 224], strides = [1, 1]} : vector<4x256xf32> to vector<4x224xf32>
    %c255_i32 = arith.constant 255 : i32
    %24 = tpu.dynamic_rotate %20 by %c255_i32 dim 1 : vector<4x256xf32>, i32 -> vector<4x256xf32>
    %25 = vector.extract_strided_slice %24 {offsets = [0, 0], sizes = [4, 224], strides = [1, 1]} : vector<4x256xf32> to vector<4x224xf32>
    %c241_i32 = arith.constant 241 : i32
    %26 = tpu.dynamic_rotate %12 by %c241_i32 dim 1 : vector<4x256xf32>, i32 -> vector<4x256xf32>
    %27 = vector.extract_strided_slice %26 {offsets = [0, 0], sizes = [4, 224], strides = [1, 1]} : vector<4x256xf32> to vector<4x224xf32>
    %c240_i32 = arith.constant 240 : i32
    %28 = tpu.dynamic_rotate %1 by %c240_i32 dim 1 : vector<4x256xf32>, i32 -> vector<4x256xf32>
    %29 = vector.extract_strided_slice %28 {offsets = [0, 0], sizes = [4, 224], strides = [1, 1]} : vector<4x256xf32> to vector<4x224xf32>
    %c239_i32 = arith.constant 239 : i32
    %30 = tpu.dynamic_rotate %20 by %c239_i32 dim 1 : vector<4x256xf32>, i32 -> vector<4x256xf32>
    %31 = vector.extract_strided_slice %30 {offsets = [0, 0], sizes = [4, 224], strides = [1, 1]} : vector<4x256xf32> to vector<4x224xf32>
    %c225_i32 = arith.constant 225 : i32
    %32 = tpu.dynamic_rotate %12 by %c225_i32 dim 1 : vector<4x256xf32>, i32 -> vector<4x256xf32>
    %33 = vector.extract_strided_slice %32 {offsets = [0, 0], sizes = [4, 224], strides = [1, 1]} : vector<4x256xf32> to vector<4x224xf32>
    %c224_i32 = arith.constant 224 : i32
    %34 = tpu.dynamic_rotate %1 by %c224_i32 dim 1 : vector<4x256xf32>, i32 -> vector<4x256xf32>
    %35 = vector.extract_strided_slice %34 {offsets = [0, 0], sizes = [4, 224], strides = [1, 1]} : vector<4x256xf32> to vector<4x224xf32>
    %c223_i32 = arith.constant 223 : i32
    %36 = tpu.dynamic_rotate %20 by %c223_i32 dim 1 : vector<4x256xf32>, i32 -> vector<4x256xf32>
    %37 = vector.extract_strided_slice %36 {offsets = [0, 0], sizes = [4, 224], strides = [1, 1]} : vector<4x256xf32> to vector<4x224xf32>
    %38 = tpu.concatenate %22, %23, %25, %27, %29, %31, %33, %35, %37 in 0 : vector<4x224xf32>, vector<4x224xf32>, vector<4x224xf32>, vector<4x224xf32>, vector<4x224xf32>, vector<4x224xf32>, vector<4x224xf32>, vector<4x224xf32>, vector<4x224xf32> -> vector<36x224xf32>
    %c0_7 = arith.constant 0 : index
    %c0_8 = arith.constant 0 : index
    %39 = vector.load %arg3[%c0_7, %c0_8] : memref<8x36xf32, #tpu.memory_space<vmem>>, vector<8x36xf32>
    %cst = arith.constant dense<0.000000e+00> : vector<8x224xf32>
    %40 = tpu.matmul %39, %38, %cst {dimension_numbers = #tpu.dot_dimension_numbers<[1], [0], [0], [1], [0, 0, 1, 1], [], []>} : vector<8x36xf32>, vector<36x224xf32>, vector<8x224xf32> -> vector<8x224xf32>
    %41 = vector.extract_strided_slice %40 {offsets = [0, 0], sizes = [8, 16], strides = [1, 1]} : vector<8x224xf32> to vector<8x16xf32>
    %42 = vector.extract_strided_slice %40 {offsets = [0, 16], sizes = [8, 16], strides = [1, 1]} : vector<8x224xf32> to vector<8x16xf32>
    %43 = arith.maximumf %41, %42 : vector<8x16xf32>
    %44 = vector.extract_strided_slice %40 {offsets = [0, 32], sizes = [8, 16], strides = [1, 1]} : vector<8x224xf32> to vector<8x16xf32>
    %45 = arith.maximumf %43, %44 : vector<8x16xf32>
    %46 = vector.extract_strided_slice %40 {offsets = [0, 48], sizes = [8, 16], strides = [1, 1]} : vector<8x224xf32> to vector<8x16xf32>
    %47 = arith.maximumf %45, %46 : vector<8x16xf32>
    %48 = vector.extract_strided_slice %40 {offsets = [0, 64], sizes = [8, 16], strides = [1, 1]} : vector<8x224xf32> to vector<8x16xf32>
    %49 = arith.maximumf %47, %48 : vector<8x16xf32>
    %50 = vector.extract_strided_slice %40 {offsets = [0, 80], sizes = [8, 16], strides = [1, 1]} : vector<8x224xf32> to vector<8x16xf32>
    %51 = arith.maximumf %49, %50 : vector<8x16xf32>
    %52 = vector.extract_strided_slice %40 {offsets = [0, 96], sizes = [8, 16], strides = [1, 1]} : vector<8x224xf32> to vector<8x16xf32>
    %53 = arith.maximumf %51, %52 : vector<8x16xf32>
    %54 = vector.extract_strided_slice %40 {offsets = [0, 112], sizes = [8, 16], strides = [1, 1]} : vector<8x224xf32> to vector<8x16xf32>
    %55 = arith.maximumf %53, %54 : vector<8x16xf32>
    %56 = vector.extract_strided_slice %40 {offsets = [0, 128], sizes = [8, 16], strides = [1, 1]} : vector<8x224xf32> to vector<8x16xf32>
    %57 = arith.maximumf %55, %56 : vector<8x16xf32>
    %58 = vector.extract_strided_slice %40 {offsets = [0, 144], sizes = [8, 16], strides = [1, 1]} : vector<8x224xf32> to vector<8x16xf32>
    %59 = arith.maximumf %57, %58 : vector<8x16xf32>
    %60 = vector.extract_strided_slice %40 {offsets = [0, 160], sizes = [8, 16], strides = [1, 1]} : vector<8x224xf32> to vector<8x16xf32>
    %61 = arith.maximumf %59, %60 : vector<8x16xf32>
    %62 = vector.extract_strided_slice %40 {offsets = [0, 176], sizes = [8, 16], strides = [1, 1]} : vector<8x224xf32> to vector<8x16xf32>
    %63 = arith.maximumf %61, %62 : vector<8x16xf32>
    %64 = vector.extract_strided_slice %40 {offsets = [0, 192], sizes = [8, 16], strides = [1, 1]} : vector<8x224xf32> to vector<8x16xf32>
    %65 = arith.maximumf %63, %64 : vector<8x16xf32>
    %66 = vector.extract_strided_slice %40 {offsets = [0, 208], sizes = [8, 16], strides = [1, 1]} : vector<8x224xf32> to vector<8x16xf32>
    %67 = arith.maximumf %65, %66 : vector<8x16xf32>
    %c0_9 = arith.constant 0 : index
    %c0_10 = arith.constant 0 : index
    %68 = vector.load %arg4[%c0_9, %c0_10] : memref<8x1xf32, #tpu.memory_space<vmem>>, vector<8x1xf32>
    %69 = vector.broadcast %68 : vector<8x1xf32> to vector<8x16xf32>
    %70 = arith.addf %67, %69 : vector<8x16xf32>
    %cst_11 = arith.constant 0.000000e+00 : f32
    %71 = vector.broadcast %cst_11 : f32 to vector<8x16xf32>
    %72 = arith.maximumf %70, %71 : vector<8x16xf32>
    %cst_12 = arith.constant 0.000000e+00 : f32
    %73 = vector.broadcast %cst_12 : f32 to vector<8x112xf32>
    %74 = tpu.concatenate %72, %73 in 1 : vector<8x16xf32>, vector<8x112xf32> -> vector<8x128xf32>
    %c0_13 = arith.constant 0 : index
    %c0_14 = arith.constant 0 : index
    %c0_15 = arith.constant 0 : index
    %75 = vector.load %arg5[%c0_13, %c0_14, %c0_15] : memref<1x8x128xf32, #tpu.memory_space<vmem>>, vector<1x8x128xf32>
    %76 = vector.shape_cast %75 : vector<1x8x128xf32> to vector<8x128xf32>
    %77 = vector.shape_cast %74 : vector<8x128xf32> to vector<1x8x128xf32>
    tpu.vector_store %arg5[%c0_13, %c0_14, %c0_15], %77 {strides = array<i32>} : memref<1x8x128xf32, #tpu.memory_space<vmem>>, vector<1x8x128xf32>,
    return
  }
  func.func @transform_0(%arg0: i32) -> (i32, i32) {
    %c0_i32 = arith.constant 0 : i32
    %c0_i32_0 = arith.constant 0 : i32
    %c0_i32_1 = arith.constant 0 : i32
    return %c0_i32, %c0_i32_0 : i32, i32
  }
  func.func @transform_1(%arg0: i32) -> (i32, i32, i32) {
    %c0_i32 = arith.constant 0 : i32
    %c0_i32_0 = arith.constant 0 : i32
    %c0_i32_1 = arith.constant 0 : i32
    return %arg0, %c0_i32, %c0_i32_0 : i32, i32, i32
  }
  func.func @transform_2(%arg0: i32) -> (i32, i32) {
    %c0_i32 = arith.constant 0 : i32
    %c0_i32_0 = arith.constant 0 : i32
    %c0_i32_1 = arith.constant 0 : i32
    return %c0_i32, %c0_i32_0 : i32, i32
  }
  func.func @transform_3(%arg0: i32) -> (i32, i32) {
    %c0_i32 = arith.constant 0 : i32
    %c0_i32_0 = arith.constant 0 : i32
    %c0_i32_1 = arith.constant 0 : i32
    return %c0_i32, %c0_i32_0 : i32, i32
  }
  func.func @transform_4(%arg0: i32) -> (i32, i32, i32) {
    %c0_i32 = arith.constant 0 : i32
    %c0_i32_0 = arith.constant 0 : i32
    %c0_i32_1 = arith.constant 0 : i32
    return %arg0, %c0_i32, %c0_i32_0 : i32, i32, i32
  }
}

</mosaic_0001>

<bundles_post_ra>
// kernel: tpu_custom_call.1
= control target key start
LH: loop header
LB: loop body
LE: loop exit
PB: predicated region body
PF: predicated region fallthrough
CT: control target
= control target key end

     0   :  { %9 = vsyncpa [#allocation3], 0  ;;  %s1056_s0 = inlined_call_operand.vmem [shape: s32[1,256], index: 0, kind: input, shape index: {}]   ;;  %s1057_s1 = inlined_call_operand.hbm [shape: f32[2,4,256], index: 1, kind: input, shape index: {}]   ;;  %s1058_s2 = inlined_call_operand.vmem [shape: f32[8,36], index: 2, kind: input, shape index: {}]   ;;  %s1059_s3 = inlined_call_operand.vmem [shape: f32[8,1], index: 3, kind: input, shape index: {}]   ;;  %s1060_s4 = inlined_call_operand.hbm [shape: f32[2,8,128], index: 4, kind: output, shape index: {}]  }
   0x1   :  { %11 = vsyncpa [#allocation3 + $0x1], 0 }
   0x2   :  { %12 = vsyncpa [#allocation4], 0 }
   0x3   :  { %14 = vsyncpa [#allocation4 + $0x1], 0  ;;  %s822_s15 = smov 0   ;;  %s824_s16 = smov 0  }
   0x4   :  { %s826_s17 = smov 0   ;;  %s828_s18 = smov 0  }
   0x5 LB: > { %s843_s19 = sadd.s32 4294967295, %s778_s18   ;;  %s558_s20 = sadd.s32 4294967294, %s778_s18   ;;  %s778_s18 = sphi %s828_s18, %s1075_s18   ;;  %s774_s17 = sphi %s826_s17, %s1074_s17   ;;  %s770_s16 = sphi %s824_s16, %s1073_s16   ;;  %s766_s15 = sphi %s822_s15, %s1072_s15  }
   0x6   : > { %s847_s21 = sadd.s32 1, %s778_s18   ;;  %s48_s22 = sadd.s32 1, %s774_s17 }
   0x7   : > { %s45_s23 = ssub.s32 %s778_s18, %s847_s21  ;;  %p55_p0 = scmp.ne.s32.totalorder %s774_s17, %s770_s16 }
   0x8   : > { %p46_p1 = scmp.eq.s32.totalorder %s45_s23, 0  ;;  %p56_p2 = scmp.eq.s32.totalorder %s778_s18, 0 }
   0x9   : > { %p61_p3 = scmp.ne.s32.totalorder %s770_s16, %s766_s15  ;;  %p62_p4 = scmp.eq.s32.totalorder %s843_s19, 0 }
   0xa   : > { %s859_s24 = scalar_select %p46_p1, %s774_s17, %s48_s22  }
   0xb   : > { %p861_p5 = por %p56_p2, %p55_p0  ;;  %p865_p6 = por %p62_p4, %p61_p3 }
   0xc   : > { %p127_p7 = scmp.eq.s32.totalorder %s843_s19, 1  ;;  %p133_p8 = scmp.eq.s32.totalorder %s558_s20, 1 }
   0xd   : > { %p595_p10 = scmp.lt.s32.totalorder %s778_s18, 2  ;;  %s162_s29 = sand.u32 1, %s774_s17  }
   0xe   : > { %p872_p11 = por %p127_p7, %p55_p0  ;;  %p876_p12 = por %p133_p8, %p61_p3 }
   0xf   : > { %s574_s30 = sshll.u32 %s778_s18, 7  ;;  %s561_s5 = sshll.u32 %s162_s29, 3 }
  0x10   : > { %s1064_s27 = scalar_select %p872_p11, 1, 0 }
  0x11   : > { %s1065_s28 = scalar_select %p876_p12, 1, 0 }
  0x12   : > { %s885_s8 = scalar_lea.hbm %s1057_s1, %s574_s30  ;;  %s166_s9 = scalar_lea.vmem [#allocation2], %s561_s5 }
  0x13   : > { %s174_s10 = sshll.u32 %s166_s9, 4  ;;  %p889_p13 = pnand %p595_p10, %p861_p5  ;;  %s893_s10 = int_to_ptr.vmem [resolvable:$true] %s174_s10 }
  0x14   : > { %s163_s12 = scalar_lea.sflag [#allocation3], %s162_s29  ;;  %s682_s13 = scalar_lea.hbm %s885_s8, 128 }
  0x15   : > { %p683_p2 = scmp.ne.s32.totalorder %s885_s8, %s682_s13  ;;  %p684_p3 = pneg %p889_p13 }
  0x16   : > { %s687_s22 = scalar_lea.hbm %s1057_s1, 256  ;;  %p688_p5 = scmp.lt.u32.totalorder %s885_s8, %s1057_s1 }
  0x17   : > { %p685_p4 = pnand %p684_p3, %p683_p2  ;;  %p689_p8 = scmp.lt.u32.totalorder %s687_s22, %s682_s13 }
  0x18   : > { %p691_p9 = scmp.lt.u32.totalorder %s682_s13, %s885_s8 }
  0x19   : > { %p686_p7 = pneg %p685_p4  ;;  %p690_p10 = por %p689_p8, %p688_p5 }
  0x1b   : > { %p692_p0 = por %p691_p9, %p690_p10 }
  0x1d   : > { %p693_p1 = pnand %p692_p0, %p686_p7 }
  0x1f   : > { %696 = shalt.err (!%p693_p1)
}
  0x20   : > { %s697_s29 = scalar_lea.vmem %s893_s10, 128  ;;  %s780_s30 = smov [#allocation2]  }
  0x21   : > { %p698_p2 = scmp.ne.s32.totalorder %s893_s10, %s697_s29  ;;  %s702_s5 = sshll.u32 %s780_s30, 4  ;;  %s703_s5 = int_to_ptr.vmem [resolvable:$false] %s702_s5 }
  0x22   : > { %s704_s6 = scalar_lea.vmem %s703_s5, 256  ;;  %p705_p11 = scmp.lt.s32.totalorder %s893_s10, %s703_s5 }
  0x23   : > { %p700_p4 = pnand %p698_p2, %p684_p3  ;;  %p706_p5 = scmp.lt.s32.totalorder %s704_s6, %s697_s29 }
  0x25   : > { %p701_p12 = pneg %p700_p4  ;;  %p707_p8 = por %p706_p5, %p705_p11 }
  0x27   : > { %p708_p9 = pnand %p707_p8, %p701_p12 }
  0x29   : > { %711 = shalt.err (!%p708_p9)
}
  0x2a   : > { %590 = dma.hbm_to_vmem [thread:$0]  (!%p889_p13), %s885_s8, 128, %s893_s10, %s163_s12  }
  0x2b   : > { %p1067_p0 = scmp.lt.s32.totalorder %s778_s18, 3  ;;  %p1068_p1 = scmp.ge.s32.totalorder %s778_s18, 1 }
  0x2d   : > { %p180_p3 = pnand %p1068_p1, %p1067_p0 }
  0x2e   : > { %s927_s7 = sand.u32 (!%p180_p3), 1, %s770_s16  }
  0x2f   : > { %183 = sbr.rel (%p180_p3) target bundleno = 588 (0x24c), region = 36  ;;  %s565_s9 = sshll.u32 (!%p180_p3), %s927_s7, 3 }
  0x30   : > { %s186_s13 = scalar_lea.sflag (!%p180_p3), [#allocation3], %s927_s7  ;;  %s189_s11 = scalar_lea.vmem (!%p180_p3), [#allocation2], %s565_s9 }
  0x36   : > { %757 = dma.done.wait (%p865_p6), %s186_s13, 128  }
  0x37   : > { %759 = vsyncadd (%p865_p6), %s186_s13, 4294967168  ;;  %v216_v0 = vlaneseq  ;;  %v937_v4 = vld [vmem:[%s189_s11] sm:$0xff]  ;;  %s781_s26 = smov 96   ;;  %s782_s12 = smov 127   ;;  %v787_v16 = vmov 0.0  }
  0x38   : > { %v215_v5 = vld [vmem:[%s1056_s0] sm:$0x3]  ;;  %v231_v6 = vcombine.high %v937_v4, %v937_v4  ;;  %s783_s14 = smov 113   ;;  %s784_s20 = smov 111   ;;  %405 = vmatprep.mubr.f32.mxu0 %v787_v16  ;;  %v301_v30 = vcombine.low %v937_v4, %v937_v4 }
  0x39   : > { %v217_v1 = vshrl.u32 %v216_v0, 7  ;;  %s785_s22 = smov 1   ;;  %s786_s23 = smov 112   ;;  %v949_v17 = vand.u32 127, %v216_v0  ;;  %v463_v16 = vld [vmem:[%s1059_s3] sm:$0xff] }
  0x3a   : > { %v644_v9 = vpack.i.bf16 %v231_v6, %v937_v4  ;;  %s788_s25 = smov 97   ;;  %s789_s29 = smov 95  }
  0x3b   : > { %v218_v2 = vsub.s32 0, %v217_v1  ;;  %v222_v3 = vsub.s32 1, %v217_v1  ;;  %vm291_vm12 = vcmp.lt.s32.totalorder %v949_v17, 96  ;;  %vm263_vm13 = vcmp.lt.s32.totalorder %v949_v17, 113  ;;  %s791_s6 = smov 64   ;;  %s792_s13 = smov 80  }
  0x3c   : > { %645 = vrot.lane.b32.xlu0 %v644_v9, %s781_s26  ;;  %vm256_vm14 = vcmp.lt.s32.totalorder %v949_v17, 127  ;;  %vm277_vm15 = vcmp.lt.s32.totalorder %v949_v17, 111  ;;  %s793_s11 = smov 32   ;;  %s794_s8 = smov 48  }
  0x3d   : > { %v219_v7 = vrot.slane %v215_v5, %v218_v2  ;;  %v223_v8 = vrot.slane %v215_v5, %v222_v3  ;;  %s795_s10 = smov 16   ;;  %s475_s30 = scalar_lea.sflag [#allocation4], %s927_s7 }
  0x3e   : > { %p1069_p11 = scmp.ne.s32.totalorder %s1064_s27, 0 }
  0x3f   : > { %vm235_vm0 = vcmp.ge.s32.totalorder %v219_v7, 1  ;;  %vm236_vm1 = vcmp.ge.s32.totalorder %v223_v8, 1  ;;  %vm237_vm2 = vcmp.lt.s32.totalorder %v219_v7, 16  ;;  %vm238_vm3 = vcmp.lt.s32.totalorder %v223_v8, 16 }
  0x40   : > { %vm239_vm4 = vmand %vm235_vm0, %vm237_vm2  ;;  %vm224_vm5 = vcmp.ge.s32.totalorder %v219_v7, 0  ;;  %vm225_vm6 = vcmp.ge.s32.totalorder %v223_v8, 0  ;;  %vm226_vm7 = vcmp.lt.s32.totalorder %v219_v7, 15  ;;  %vm227_vm9 = vcmp.lt.s32.totalorder %v223_v8, 15 }
  0x41   : > { %vm240_vm8 = vmand %vm236_vm1, %vm238_vm3  ;;  %v241_v10 = vsel %vm239_vm4, %v937_v4, 0.0  ;;  %vm270_vm0 = vcmp.lt.s32.totalorder %v949_v17, 112  ;;  %vm284_vm1 = vcmp.lt.s32.totalorder %v949_v17, 97  ;;  %vm321_vm2 = vcmask 1043456  }
  0x42   : > { %v242_v11 = vsel %vm240_vm8, %v231_v6, 0.0  ;;  %vm228_vm10 = vmand %vm224_vm5, %vm226_vm7  ;;  %vm249_vm3 = vcmp.lt.s32.totalorder %v949_v17, 1  ;;  %vm298_vm4 = vcmp.lt.s32.totalorder %v949_v17, 95  ;;  %vm331_vm5 = vcmask 293888  }
  0x43   : > { %v659_v12 = vpack.i.bf16 %v242_v11, %v241_v10  ;;  %vm229_vm11 = vmand %vm225_vm6, %vm227_vm9  ;;  %v233_v13 = vsel %vm228_vm10, %v937_v4, 0.0  ;;  %vm471_vm6 = vcmask 130048  }
  0x44   : > { %v234_v14 = vsel %vm229_vm11, %v231_v6, 0.0 }
  0x45   : > { %660 = vrot.lane.b32.xlu1 %v659_v12, %s782_s12  ;;  %v649_v15 = vpack.i.bf16 %v234_v14, %v233_v13  ;;  %v790_v13 = vmov 0  }
  0x46   : > { %679 = vset.pattern.permute.xlu0 %v790_v13 }
  0x47   : > { %650 = vrot.lane.b32.xlu0 %v649_v15, %s783_s14 }
  0x49   : > { %665 = vrot.lane.b32.xlu1 %v659_v12, %s784_s20  ;;  %v330_v12 = vld [vmem:[%s1058_s2] sm:$0xff]  ;;  %s213_s20 = scalar_lea.vmem [#allocation5], %s565_s9 }
  0x4b   : > { %655 = vrot.lane.b32.xlu0 %v649_v15, %s785_s22  ;;  %s488_s22 = sshll.u32 %s213_s20, 4  ;;  %s1014_s22 = int_to_ptr.vmem [resolvable:$true] %s488_s22 }
  0x4c   : > { %s712_s5 = scalar_lea.vmem %s1014_s22, 128 }
  0x4d   : > { %670 = vrot.lane.b32.xlu1 %v644_v9, %s786_s23  ;;  %p713_p6 = scmp.ne.s32.totalorder %s1014_s22, %s712_s5 }
  0x4f   : > { %675 = vrot.lane.b32.xlu0 %v649_v15, %s788_s25  ;;  %p714_p12 = pnand %p713_p6, %p1069_p11 }
  0x51   : > { %294 = vrot.lane.b32.xlu1 %v241_v10, %s789_s29  ;;  %p715_p13 = pneg %p714_p12 }
  0x53   : > { %296 = vrot.lane.b32.xlu0 %v242_v11, %s789_s29 }
  0xae   : > { %v646_v18 = vpop.permute.xlu0 %645 }
  0xaf   : > { %v648_v19 = vunpack.i.h.bf16 %v646_v18  ;;  %v647_v20 = vunpack.i.l.bf16 %v646_v18 }
  0xb1   : > { %v292_v23 = vsel %vm291_vm12, %v647_v20, %v648_v19  ;;  %v293_v24 = vsel %vm291_vm12, %v648_v19, %v647_v20 }
  0xb2   : > { %v317_v35 = vrot.slane %v292_v23, 4  ;;  %v318_v36 = vrot.slane %v293_v24, 4 }
  0xb7   : > { %v661_v21 = vpop.permute.xlu1 %660 }
  0xb8   : > { %v663_v27 = vunpack.i.h.bf16 %v661_v21  ;;  %v662_v28 = vunpack.i.l.bf16 %v661_v21 }
  0xb9   : > { %v651_v22 = vpop.permute.xlu0 %650 }
  0xba   : > { %v653_v25 = vunpack.i.h.bf16 %v651_v22  ;;  %v652_v26 = vunpack.i.l.bf16 %v651_v22  ;;  %v258_v47 = vsel %vm256_vm14, %v663_v27, %v662_v28  ;;  %v257_v48 = vsel %vm256_vm14, %v662_v28, %v663_v27 }
  0xbb   : > { %v666_v29 = vpop.permute.xlu1 %665 }
  0xbc   : > { %v264_v31 = vsel %vm263_vm13, %v652_v26, %v653_v25  ;;  %v668_v32 = vunpack.i.h.bf16 %v666_v29  ;;  %v667_v33 = vunpack.i.l.bf16 %v666_v29  ;;  %v265_v34 = vsel %vm263_vm13, %v653_v25, %v652_v26 }
  0xbd   : > { %v305_v37 = vrot.slane %v264_v31, 4  ;;  %v656_v38 = vpop.permute.xlu0 %655  ;;  %v306_v39 = vrot.slane %v265_v34, 4 }
  0xbe   : > { %v278_v40 = vsel %vm277_vm15, %v667_v33, %v668_v32  ;;  %v279_v41 = vsel %vm277_vm15, %v668_v32, %v667_v33  ;;  %v658_v42 = vunpack.i.h.bf16 %v656_v38  ;;  %v657_v43 = vunpack.i.l.bf16 %v656_v38 }
  0xbf   : > { %v311_v44 = vrot.slane %v278_v40, 4  ;;  %v312_v45 = vrot.slane %v279_v41, 4  ;;  %v671_v46 = vpop.permute.xlu1 %670  ;;  %v325_v55 = vsel %vm321_vm2, %v258_v47, %v306_v39  ;;  %v324_v57 = vsel %vm321_vm2, %v257_v48, %v305_v37 }
  0xc0   : > { %v673_v49 = vunpack.i.h.bf16 %v671_v46  ;;  %v672_v50 = vunpack.i.l.bf16 %v671_v46  ;;  %v250_v51 = vsel %vm249_vm3, %v657_v43, %v658_v42  ;;  %v251_v52 = vsel %vm249_vm3, %v658_v42, %v657_v43 }
  0xc1   : > { %v676_v53 = vpop.permute.xlu0 %675  ;;  %v323_v54 = vsel %vm321_vm2, %v250_v51, %v937_v4  ;;  %v322_v56 = vsel %vm321_vm2, %v251_v52, %v301_v30 }
  0xc2   : > { %v271_v58 = vsel %vm270_vm0, %v672_v50, %v673_v49  ;;  %v272_v59 = vsel %vm270_vm0, %v673_v49, %v672_v50  ;;  %v678_v60 = vunpack.i.h.bf16 %v676_v53  ;;  %v677_v61 = vunpack.i.l.bf16 %v676_v53 }
  0xc3   : > { %v575_v62 = vpack.c.bf16 %v325_v55, %v323_v54  ;;  %v577_v63 = vpack.c.bf16 %v324_v57, %v322_v56  ;;  %v327_v0 = vsel %vm321_vm2, %v272_v59, %v312_v45  ;;  %v326_v1 = vsel %vm321_vm2, %v271_v58, %v311_v44  ;;  %v295_v6 = vpop.permute.xlu1 %294 }
  0xc4   : > { %v285_v2 = vsel %vm284_vm1, %v677_v61, %v678_v60  ;;  %v286_v3 = vsel %vm284_vm1, %v678_v60, %v677_v61 }
  0xc5   : > { %576 = vmatprep.subr.bf16.mxu0 %v575_v62  ;;  %v329_v4 = vsel %vm321_vm2, %v286_v3, %v318_v36  ;;  %v328_v5 = vsel %vm321_vm2, %v285_v2, %v317_v35  ;;  %v297_v7 = vpop.permute.xlu0 %296 }
  0xc6   : > { %578 = vmatpush1.bf16.msra.mxu0 %v577_v63  ;;  %v579_v8 = vpack.c.bf16 %v329_v4, %v327_v0  ;;  %v581_v9 = vpack.c.bf16 %v328_v5, %v326_v1  ;;  %v300_v10 = vsel %vm298_vm4, %v297_v7, %v295_v6  ;;  %v299_v11 = vsel %vm298_vm4, %v295_v6, %v297_v7 }
  0xc8   : > { %580 = vmatprep.subr.bf16.mxu0 %v579_v8 }
  0xca   : > { %582 = vmatpush1.bf16.msra.mxu0 %v581_v9 }
  0xcb   : > { %567 = vmatprep.subr.msk.mxu0 %vm321_vm2, %v300_v10 }
  0xce   : > { %568 = vmatpush1.msk.msra.mxu0 %vm321_vm2, %v299_v11 }
  0xcf   : > { %569 = vmatmul.mubr.msk.f32.vlgmr.msra.gmra.mrb[0].mxu0 %vm331_vm5, %v330_v12 }
 0x1a2   : > { %v407_v14 = vpop.f32.mrb[0].mxu0 }
 0x1a3   : > { %417 = vrot.lane.b32.xlu0 %v407_v14, %s781_s26  ;;  %413 = vrot.lane.b32.xlu1 %v407_v14, %s786_s23  ;;  %v409_v15 = vpop.f32.mrb[1].mxu0 }
 0x1a7   : > { %425 = vrot.lane.b32.xlu0 %v407_v14, %s791_s6  ;;  %421 = vrot.lane.b32.xlu1 %v407_v14, %s792_s13 }
 0x1ab   : > { %433 = vrot.lane.b32.xlu0 %v407_v14, %s793_s11  ;;  %429 = vrot.lane.b32.xlu1 %v407_v14, %s794_s8 }
 0x1af   : > { %437 = vrot.lane.b32.xlu1 %v407_v14, %s795_s10  ;;  %443 = vrot.lane.b32.xlu0 %v409_v15, %s786_s23 }
 0x1b3   : > { %447 = vrot.lane.b32.xlu1 %v409_v15, %s781_s26  ;;  %466 = vperm.xlu0 %679, %v463_v16   ;;  %s571_s26 = sshll.u32 %s843_s19, 7  ;;  %s796_s19 = smov [#allocation5]  }
 0x1b4   : > { %s1012_s29 = scalar_lea.hbm %s1060_s4, %s571_s26  ;;  %s716_s9 = sshll.u32 %s796_s19, 4  ;;  %s717_s9 = int_to_ptr.vmem [resolvable:$false] %s716_s9 }
 0x1b5   : > { %p719_p7 = scmp.lt.s32.totalorder %s1014_s22, %s717_s9 }
 0x1b7   : > { %451 = vrot.lane.b32.xlu1 %v409_v15, %s792_s13  ;;  %459 = vrot.lane.b32.xlu0 %v409_v15, %s794_s8 }
 0x1bb   : > { %455 = vrot.lane.b32.xlu1 %v409_v15, %s791_s6  ;;  %s718_s6 = scalar_lea.vmem %s717_s9, 256 }
 0x1bc   : > { %p720_p10 = scmp.lt.s32.totalorder %s718_s6, %s712_s5 }
 0x1be   : > { %p721_p2 = por %p720_p10, %p719_p7 }
 0x1c0   : > { %p722_p4 = pnand %p721_p2, %p715_p13 }
 0x215   : > { %v418_v17 = vpop.permute.xlu0 %417  ;;  %v414_v18 = vpop.permute.xlu1 %413 }
 0x216   : > { %v416_v19 = vmax.f32 %v407_v14, %v414_v18 }
 0x218   : > { %v420_v20 = vmax.f32 %v416_v19, %v418_v17 }
 0x219   : > { %v426_v21 = vpop.permute.xlu0 %425  ;;  %v422_v22 = vpop.permute.xlu1 %421 }
 0x21a   : > { %v424_v23 = vmax.f32 %v420_v20, %v422_v22 }
 0x21c   : > { %v428_v24 = vmax.f32 %v424_v23, %v426_v21 }
 0x21d   : > { %v430_v25 = vpop.permute.xlu1 %429  ;;  %v434_v27 = vpop.permute.xlu0 %433 }
 0x21e   : > { %v432_v26 = vmax.f32 %v428_v24, %v430_v25 }
 0x220   : > { %v436_v28 = vmax.f32 %v432_v26, %v434_v27 }
 0x221   : > { %v438_v29 = vpop.permute.xlu1 %437  ;;  %v444_v33 = vpop.permute.xlu0 %443 }
 0x222   : > { %v440_v30 = vmax.f32 %v436_v28, %v438_v29 }
 0x224   : > { %v441_v31 = vmax.f32 %v440_v30, %v409_v15 }
 0x225   : > { %v448_v32 = vpop.permute.xlu1 %447 }
 0x226   : > { %v446_v34 = vmax.f32 %v441_v31, %v444_v33 }
 0x228   : > { %v450_v36 = vmax.f32 %v446_v34, %v448_v32 }
 0x229   : > { %v452_v35 = vpop.permute.xlu1 %451 }
 0x22a   : > { %v454_v39 = vmax.f32 %v450_v36, %v452_v35 }
 0x22d   : > { %v456_v37 = vpop.permute.xlu1 %455 }
 0x22e   : > { %v458_v40 = vmax.f32 %v454_v39, %v456_v37 }
 0x232   : > { %v467_v38 = vpop.permute.xlu0 %466 }
 0x236   : > { %v460_v41 = vpop.permute.xlu0 %459 }
 0x237   : > { %v462_v42 = vmax.f32 %v458_v40, %v460_v41 }
 0x239   : > { %v469_v43 = vadd.f32 %v467_v38, %v462_v42 }
 0x23b   : > { %v470_v44 = vmax.f32 %v469_v43, 0.0 }
 0x23d   : > { %v472_v45 = vsel %vm471_vm6, %v470_v44, 0.0 }
 0x23e   : > { %473 = vst [vmem:[%s213_s20] sm:$0xff] %v472_v45 }
 0x23f   : > { %725 = shalt.err (!%p722_p4)
}
 0x240   : > { %s726_s7 = scalar_lea.hbm %s1012_s29, 128  ;;  %s730_s8 = scalar_lea.hbm %s1060_s4, 256 }
 0x241   : > { %p727_p5 = scmp.ne.s32.totalorder %s1012_s29, %s726_s7  ;;  %p731_p0 = scmp.lt.u32.totalorder %s1012_s29, %s1060_s4 }
 0x242   : > { %p732_p1 = scmp.lt.u32.totalorder %s730_s8, %s726_s7  ;;  %p734_p6 = scmp.lt.u32.totalorder %s726_s7, %s1012_s29 }
 0x243   : > { %p728_p8 = pnand %p727_p5, %p1069_p11 }
 0x244   : > { %p733_p3 = por %p732_p1, %p731_p0 }
 0x245   : > { %p729_p9 = pneg %p728_p8 }
 0x246   : > { %p735_p12 = por %p734_p6, %p733_p3 }
 0x248   : > { %p736_p13 = pnand %p735_p12, %p729_p9 }
 0x24a   : > { %739 = shalt.err (!%p736_p13)
}
 0x24b   : > { %585 = dma.vmem_to_hbm [thread:$0]  (%p1069_p11), %s1014_s22, 128, %s1012_s29, %s475_s30  }
 0x24c PF: > { %s500_s14 = sand.u32 1, %s766_s15   ;;  %p1070_p7 = scmp.ne.s32.totalorder %s1065_s28, 0 }
 0x24d   : > { %p1071_p10 = scmp.ge.s32.totalorder %s778_s18, 2  ;;  %s501_s26 = scalar_lea.sflag [#allocation4], %s500_s14 }
 0x24f   : > { %p592_p2 = pnand %p1071_p10, %p1070_p7 }
 0x251   : > { %761 = dma.done.wait (!%p592_p2), %s501_s26, 128  }
 0x252   : > { %763 = vsyncadd (!%p592_p2), %s501_s26, 4294967168  ;;  %p17_p4 = scmp.ge.s32.totalorder %s847_s21, 4   ;;  %s1072_s15 = smov %s770_s16 }
 0x253   : > { %s1073_s16 = smov %s774_s17  ;;  %s1074_s17 = smov %s859_s24 }
 0x254   : > { %s1075_s18 = smov %s847_s21  ;;  %19 = sbr.rel (!%p17_p4) target bundleno = 5 (0x5), region = 81 }
 0x25b   :  { %506 = vsyncpa [#allocation3], 1 }
 0x25c   :  { %508 = vsyncpa [#allocation3 + $0x1], 1 }
 0x25d   :  { %509 = vsyncpa [#allocation4], 1 }
 0x25e   :  { %511 = vsyncpa [#allocation4 + $0x1], 1 }

</bundles_post_ra>
